<compile_context>
chip_gen: v5e
topology: v5e:2x2
jax: 0.10.0
libtpu: 0.0.40
codegen_flags: <defaults>
</compile_context>

<pallas_src>
import functools

import jax
import jax.numpy as jnp
from jax.experimental import pallas as pl
from jax.experimental.pallas import tpu as pltpu


def _layernorm_kernel(x_ref, params_ref, o_ref, *, eps):
    # x_ref: (tile_rows, D); params_ref: (2, D) f32 = [scale; shift]
    x = x_ref[...].astype(jnp.float32)          # no-op when input is already f32
    params = params_ref[...]
    scale = params[0:1, :]
    shift = params[1:2, :]

    mean = jnp.mean(x, axis=-1, keepdims=True)
    centered = x - mean
    # unbiased=False -> population variance (divide by D)
    var = jnp.mean(centered * centered, axis=-1, keepdims=True)
    inv_std = jax.lax.rsqrt(var + eps)

    out = scale * (centered * inv_std) + shift
    o_ref[...] = out.astype(o_ref.dtype)


def _pick_row_tile(R, D, x_bytes, out_bytes):
    """Pick a row tile sized for ~32 MiB of in-flight VMEM (safe on all gens)."""
    # Sublane packing alignment for the second-to-last block dim.
    if x_bytes >= 4:
        align = 8
    elif x_bytes == 2:
        align = 16
    else:
        align = 32

    budget = 32 * 1024 * 1024
    # Double-buffered input + output tiles, plus ~2 f32 temporaries per element.
    per_row = D * (2 * x_bytes + 2 * out_bytes + 8)
    tile = max(align, (budget // per_row) // align * align)
    tile = min(tile, 2048)                       # keep per-step DMAs sane / grid >= 2 when possible
    r_up = ((R + align - 1) // align) * align    # no point tiling past the row count
    return max(align, min(tile, r_up))


def layer_norm(x, scale, shift, *, eps=1e-5, row_tile=None):
    """LayerNorm over the last axis. x: [..., D], scale/shift: [D]."""
    orig_shape = x.shape
    D = orig_shape[-1]
    x2 = x.reshape(-1, D)
    R = x2.shape[0]

    x_bytes = jnp.dtype(x.dtype).itemsize
    out_bytes = x_bytes
    if row_tile is None:
        row_tile = _pick_row_tile(R, D, x_bytes, out_bytes)

    # Fuse scale/shift into one f32 (2, D) parameter slab (single DMA stream).
    params = jnp.stack(
        [scale.astype(jnp.float32), shift.astype(jnp.float32)], axis=0
    )

    # TODO(synk): for production, D should be a multiple of 128 for lane-dense
    # stores; D < 128 (as in this demo) lowers to masked partial stores.

    grid = (pl.cdiv(R, row_tile),)  # partial last block is masked by Pallas
    out = pl.pallas_call(
        functools.partial(_layernorm_kernel, eps=eps),
        out_shape=jax.ShapeDtypeStruct((R, D), x.dtype),
        grid_spec=pltpu.PrefetchScalarGridSpec(
            num_scalar_prefetch=0,
            grid=grid,
            in_specs=[
                pl.BlockSpec((row_tile, D), lambda i: (i, 0)),
                pl.BlockSpec((2, D), lambda i: (0, 0)),
            ],
            out_specs=pl.BlockSpec((row_tile, D), lambda i: (i, 0)),
        ),
        compiler_params=pltpu.CompilerParams(
            dimension_semantics=("parallel",),      # v7x: shard rows across both TCs
            vmem_limit_bytes=48 * 1024 * 1024,      # fits v7x 64 MiB, generous on v5e/v6e
        ),
    )(x2, params)

    return out.reshape(orig_shape)


if __name__ == "__main__":
    key = jax.random.PRNGKey(0)
    batch, seq, emb_dim = 2, 8, 32

    x = jax.random.normal(key, (batch, seq, emb_dim), dtype=jnp.float32)
    # Deterministic parameter init matching nn.Parameter(torch.ones/zeros(emb_dim))
    scale = jnp.ones((emb_dim,), dtype=jnp.float32)
    shift = jnp.zeros((emb_dim,), dtype=jnp.float32)

    out = layer_norm(x, scale, shift)
    out = jax.block_until_ready(out)

    # Reference check in plain JAX (same semantics as the PyTorch module).
    mean = jnp.mean(x, axis=-1, keepdims=True)
    var = jnp.mean((x - mean) ** 2, axis=-1, keepdims=True)
    ref = scale * ((x - mean) / jnp.sqrt(var + 1e-5)) + shift
    assert jnp.allclose(out, ref, atol=1e-5, rtol=1e-5), "mismatch vs reference"

    print("KERNEL_OK")
</pallas_src>

<mosaic_0001>
module attributes {stable_mosaic.version = 11 : i64} {
  func.func @_layernorm_kernel(%arg0: i32, %arg1: memref<16x32xf32, #tpu.memory_space<vmem>>, %arg2: memref<2x32xf32, #tpu.memory_space<vmem>>, %arg3: memref<16x32xf32, #tpu.memory_space<vmem>>) attributes {dimension_semantics = [#tpu.dimension_semantics<parallel>], iteration_bounds = array<i64: 1>, scalar_prefetch = 0 : i64, scratch_operands = 0 : i64, tpu.core_type = #tpu.core_type<tc>, window_params = [{transform_indices = @transform_0, window_bounds = array<i64: 16, 32>}, {pipeline_mode = #tpu.pipeline_mode<synchronous>, transform_indices = @transform_1, window_bounds = array<i64: 2, 32>}, {transform_indices = @transform_2, window_bounds = array<i64: 16, 32>}]} {
    %c0 = arith.constant 0 : index
    %c0_0 = arith.constant 0 : index
    %0 = vector.load %arg1[%c0, %c0_0] : memref<16x32xf32, #tpu.memory_space<vmem>>, vector<16x32xf32>
    %c0_1 = arith.constant 0 : index
    %c0_2 = arith.constant 0 : index
    %1 = vector.load %arg2[%c0_1, %c0_2] : memref<2x32xf32, #tpu.memory_space<vmem>>, vector<2x32xf32>
    %2 = vector.extract_strided_slice %1 {offsets = [0, 0], sizes = [1, 32], strides = [1, 1]} : vector<2x32xf32> to vector<1x32xf32>
    %3 = vector.extract_strided_slice %1 {offsets = [1, 0], sizes = [1, 32], strides = [1, 1]} : vector<2x32xf32> to vector<1x32xf32>
    %cst = arith.constant dense<0.000000e+00> : vector<16xf32>
    %4 = vector.multi_reduction <add>, %0, %cst [1] : vector<16x32xf32> to vector<16xf32>
    %5 = vector.shape_cast %4 : vector<16xf32> to vector<16x1xf32>
    %cst_3 = arith.constant 3.200000e+01 : f32
    %6 = vector.broadcast %cst_3 : f32 to vector<16x1xf32>
    %7 = arith.divf %5, %6 : vector<16x1xf32>
    %8 = vector.broadcast %7 : vector<16x1xf32> to vector<16x32xf32>
    %9 = arith.subf %0, %8 : vector<16x32xf32>
    %10 = arith.mulf %9, %9 : vector<16x32xf32>
    %cst_4 = arith.constant dense<0.000000e+00> : vector<16xf32>
    %11 = vector.multi_reduction <add>, %10, %cst_4 [1] : vector<16x32xf32> to vector<16xf32>
    %12 = vector.shape_cast %11 : vector<16xf32> to vector<16x1xf32>
    %cst_5 = arith.constant 3.200000e+01 : f32
    %13 = vector.broadcast %cst_5 : f32 to vector<16x1xf32>
    %14 = arith.divf %12, %13 : vector<16x1xf32>
    %cst_6 = arith.constant 9.99999974E-6 : f32
    %15 = vector.broadcast %cst_6 : f32 to vector<16x1xf32>
    %16 = arith.addf %14, %15 : vector<16x1xf32>
    %17 = math.rsqrt %16 : vector<16x1xf32>
    %18 = vector.broadcast %17 : vector<16x1xf32> to vector<16x32xf32>
    %19 = arith.mulf %9, %18 : vector<16x32xf32>
    %20 = vector.broadcast %2 : vector<1x32xf32> to vector<16x32xf32>
    %21 = arith.mulf %20, %19 : vector<16x32xf32>
    %22 = vector.broadcast %3 : vector<1x32xf32> to vector<16x32xf32>
    %23 = arith.addf %21, %22 : vector<16x32xf32>
    %c0_7 = arith.constant 0 : index
    %c0_8 = arith.constant 0 : index
    %24 = vector.load %arg3[%c0_7, %c0_8] : memref<16x32xf32, #tpu.memory_space<vmem>>, vector<16x32xf32>
    tpu.vector_store %arg3[%c0_7, %c0_8], %23 {strides = array<i32>} : memref<16x32xf32, #tpu.memory_space<vmem>>, vector<16x32xf32>,
    return
  }
  func.func @transform_0(%arg0: i32) -> (i32, i32) {
    %c0_i32 = arith.constant 0 : i32
    %c0_i32_0 = arith.constant 0 : i32
    return %arg0, %c0_i32 : i32, i32
  }
  func.func @transform_1(%arg0: i32) -> (i32, i32) {
    %c0_i32 = arith.constant 0 : i32
    %c0_i32_0 = arith.constant 0 : i32
    %c0_i32_1 = arith.constant 0 : i32
    return %c0_i32, %c0_i32_0 : i32, i32
  }
  func.func @transform_2(%arg0: i32) -> (i32, i32) {
    %c0_i32 = arith.constant 0 : i32
    %c0_i32_0 = arith.constant 0 : i32
    return %arg0, %c0_i32 : i32, i32
  }
}

</mosaic_0001>

<bundles_post_ra>
// kernel: tpu_custom_call.1
= control target key start
LH: loop header
LB: loop body
LE: loop exit
PB: predicated region body
PF: predicated region fallthrough
CT: control target
= control target key end

     0   :  { %7 = vsyncpa [#allocation3], 0  ;;  %s257_s0 = inlined_call_operand.hbm [shape: f32[16,32], index: 0, kind: input, shape index: {}]   ;;  %s258_s1 = inlined_call_operand.hbm [shape: f32[2,32], index: 1, kind: input, shape index: {}]   ;;  %s259_s2 = inlined_call_operand.hbm [shape: f32[16,32], index: 2, kind: output, shape index: {}]  }
   0x1   :  { %8 = vsyncpa [#allocation6], 0 }
   0x2   :  { %9 = vsyncpa [#allocation4], 0  ;;  %s14_s11 = sshll.u32 %s257_s0, 4  ;;  %s215_s12 = smov [#allocation2]   ;;  %s15_s11 = int_to_ptr.hbm [resolvable:$true] %s14_s11 }
   0x3   :  { %s16_s13 = sshll.u32 %s215_s12, 4  ;;  %s28_s16 = sshll.u32 %s258_s1, 4  ;;  %s17_s13 = int_to_ptr.vmem [resolvable:$true] %s16_s13  ;;  %s29_s16 = int_to_ptr.hbm [resolvable:$true] %s28_s16 }
   0x4   :  { %s216_s17 = smov 128   ;;  %s217_s18 = smov 8  }
   0x5   :  { %22 = dma.hbm_to_vmem [thread:$0]  %s15_s11, 256, %s17_s13, [#allocation3], %s216_s17, %s216_s17, %s217_s18  }
   0x6   :  { %s218_s19 = smov [#allocation5]  }
   0x7   :  { %s30_s20 = sshll.u32 %s218_s19, 4  ;;  %s31_s20 = int_to_ptr.vmem [resolvable:$true] %s30_s20 }
   0x8   :  { %33 = dma.hbm_to_vmem [thread:$0]  %s29_s16, 32, %s31_s20, [#allocation6]  }
   0x9   :  { %209 = dma.done.wait [#allocation3], 256  }
   0xa   :  { %210 = vsyncadd [#allocation3], 4294967040 }
   0xb   :  { %211 = dma.done.wait [#allocation6], 32  }
   0xc   :  { %212 = vsyncadd [#allocation6], 4294967264  ;;  %vm45_vm0 = vcmask 261120   ;;  %v42_v0 = vld [vmem:[#allocation2] sm:$0xff]  ;;  %v43_v2 = vld [vmem:[#allocation2 + $0x8] sm:$0xff]  ;;  %v219_v4 = vmov 32.0  }
   0xd   :  { %v46_v1 = vsel %vm45_vm0, %v42_v0, 0.0  ;;  %v49_v3 = vsel %vm45_vm0, %v43_v2, 0.0  ;;  %131 = vrcp.f32 %v219_v4  ;;  %v44_v31 = vld [vmem:[#allocation5] sm:$0x3]  ;;  %s220_s0 = smov [#allocation7]   ;;  %s111_s23 = sshll.u32 %s259_s2, 4  ;;  %s112_s23 = int_to_ptr.hbm [resolvable:$true] %s111_s23 }
   0xe   :  { %47 = vadd.xlane.f32.xlu0 %v46_v1  ;;  %v97_v36 = vperm.slane %v44_v31, 0  ;;  %v100_v40 = vperm.slane %v44_v31, 1  ;;  %s109_s1 = sshll.u32 %s220_s0, 4  ;;  %s110_s1 = int_to_ptr.vmem [resolvable:$true] %s109_s1 }
  0x13   :  { %v132_v5 = vpop.eup %131 }
  0x14   :  { %v53_v6 = vmul.f32 32.0, %v132_v5  ;;  %vm57_vm1 = vweird.f32 %v132_v5 }
  0x16   :  { %50 = vadd.xlane.f32.xlu0 %v49_v3  ;;  %v54_v7 = vsub.f32 1.0, %v53_v6 }
  0x18   :  { %v55_v8 = vmul.f32 %v132_v5, %v54_v7 }
  0x1a   :  { %v56_v9 = vadd.f32 %v132_v5, %v55_v8 }
  0x1c   :  { %v58_v10 = vsel %vm57_vm1, %v132_v5, %v56_v9 }
  0x81   :  { %v48_v11 = vpop.xlane.xlu0 %47 }
  0x82   :  { %v59_v12 = vmul.f32 %v58_v10, %v48_v11 }
  0x84   :  { %v61_v13 = vsub.f32 %v42_v0, %v59_v12 }
  0x86   :  { %v63_v14 = vmul.f32 %v61_v13, %v61_v13 }
  0x88   :  { %v65_v15 = vsel %vm45_vm0, %v63_v14, 0.0 }
  0x89   :  { %66 = vadd.xlane.f32.xlu1 %v65_v15  ;;  %v51_v16 = vpop.xlane.xlu0 %50 }
  0x8a   :  { %v60_v17 = vmul.f32 %v58_v10, %v51_v16 }
  0x8c   :  { %v62_v18 = vsub.f32 %v43_v2, %v60_v17 }
  0x8e   :  { %v64_v19 = vmul.f32 %v62_v18, %v62_v18 }
  0x90   :  { %v68_v20 = vsel %vm45_vm0, %v64_v19, 0.0 }
  0x91   :  { %69 = vadd.xlane.f32.xlu1 %v68_v20 }
  0xfc   :  { %v67_v21 = vpop.xlane.xlu1 %66 }
  0xfd   :  { %v71_v22 = vmul.f32 %v67_v21, %v58_v10 }
  0xff   :  { %v73_v23 = vadd.f32 1e-05, %v71_v22 }
 0x101   :  { %133 = vrsqrt.f32 %v73_v23  ;;  %vm81_vm3 = vweird.f32 %v73_v23 }
 0x104   :  { %v70_v24 = vpop.xlane.xlu1 %69 }
 0x105   :  { %v72_v25 = vmul.f32 %v70_v24, %v58_v10 }
 0x107   :  { %v134_v26 = vpop.eup %133  ;;  %v74_v27 = vadd.f32 1e-05, %v72_v25 }
 0x108   :  { %v76_v28 = vmul.f32 %v134_v26, %v73_v23  ;;  %vm82_vm2 = vweird.f32 %v134_v26 }
 0x109   :  { %135 = vrsqrt.f32 %v74_v27  ;;  %vm83_vm4 = vmor %vm81_vm3, %vm82_vm2  ;;  %vm91_vm6 = vweird.f32 %v74_v27 }
 0x10a   :  { %v77_v29 = vmul.f32 %v134_v26, %v76_v28 }
 0x10c   :  { %v78_v30 = vmul.f32 0.5, %v77_v29 }
 0x10e   :  { %v79_v32 = vsub.f32 1.5, %v78_v30 }
 0x10f   :  { %v136_v33 = vpop.eup %135 }
 0x110   :  { %v80_v34 = vmul.f32 %v134_v26, %v79_v32  ;;  %v86_v35 = vmul.f32 %v136_v33, %v74_v27  ;;  %vm92_vm5 = vweird.f32 %v136_v33 }
 0x111   :  { %vm93_vm7 = vmor %vm91_vm6, %vm92_vm5 }
 0x112   :  { %v84_v37 = vsel %vm83_vm4, %v134_v26, %v80_v34  ;;  %v87_v38 = vmul.f32 %v136_v33, %v86_v35 }
 0x113   :  { %v95_v39 = vmul.f32 %v84_v37, %v61_v13 }
 0x114   :  { %v88_v41 = vmul.f32 0.5, %v87_v38 }
 0x115   :  { %v98_v42 = vmul.f32 %v97_v36, %v95_v39 }
 0x116   :  { %v89_v43 = vsub.f32 1.5, %v88_v41 }
 0x117   :  { %v101_v44 = vadd.f32 %v100_v40, %v98_v42 }
 0x118   :  { %v90_v45 = vmul.f32 %v136_v33, %v89_v43 }
 0x119   :  { %103 = vst.msk [vmem:[#allocation7] sm:$0xff] %vm45_vm0, %v101_v44 }
 0x11a   :  { %v94_v46 = vsel %vm93_vm7, %v136_v33, %v90_v45 }
 0x11b   :  { %v96_v47 = vmul.f32 %v94_v46, %v62_v18 }
 0x11d   :  { %v99_v48 = vmul.f32 %v97_v36, %v96_v47 }
 0x11f   :  { %v102_v49 = vadd.f32 %v100_v40, %v99_v48 }
 0x121   :  { %104 = vst.msk [vmem:[#allocation7 + $0x8] sm:$0xff] %vm45_vm0, %v102_v49 }
 0x122   :  { %117 = dma.vmem_to_hbm [thread:$0]  %s110_s1, 256, %s112_s23, [#allocation4], %s216_s17, %s216_s17, %s217_s18  }
 0x123   :  { %213 = dma.done.wait [#allocation4], 256  }
 0x124   :  { %214 = vsyncadd [#allocation4], 4294967040 }
 0x125   :  { %122 = vsyncpa [#allocation3], 1 }
 0x126   :  { %123 = vsyncpa [#allocation6], 1 }
 0x127   :  { %124 = vsyncpa [#allocation4], 1 }

</bundles_post_ra>
